<compile_context>
chip_gen: v7x
topology: tpu7x:2x2x1
jax: 0.10.0
libtpu: 0.0.40
codegen_flags: <defaults>
</compile_context>

<pallas_src>
import jax
import jax.numpy as jnp
from jax import lax
from jax.experimental import pallas as pl
from jax.experimental.pallas import tpu as pltpu

EPS = 1e-06
_MIB = 1024 * 1024


def _cdiv(a, b):
    return -(-a // b)


def _round_up(a, b):
    return _cdiv(a, b) * b


def _tpu_kind() -> str:
    try:
        return jax.devices()[0].device_kind.lower()
    except Exception:
        return ""


def _gen_params():
    """Generation-aware tile budget / core split / VMEM cap."""
    kind = _tpu_kind()
    if "v7" in kind:
        # 2 TCs per chip, 64 MiB VMEM per TC, ~3.2 TB/s: big tiles, hard VMEM cap.
        return dict(n_cores=2, tile_bytes=8 * _MIB, vmem_cap=48 * _MIB)
    if "v6" in kind:
        return dict(n_cores=1, tile_bytes=6 * _MIB, vmem_cap=100 * _MIB)
    if "v5" in kind:
        return dict(n_cores=1, tile_bytes=2 * _MIB, vmem_cap=100 * _MIB)
    # Unknown backend (incl. interpret mode): conservative defaults.
    return dict(n_cores=1, tile_bytes=4 * _MIB, vmem_cap=48 * _MIB)


def _make_cce_kernel(*, n, c, tm, tc, tiles_per_core, has_row_tail, has_class_tail):
    """Builds the kernel; the tail-masking path is only generated if needed."""
    need_tail = has_row_tail or has_class_tail

    def kernel(inp_ref, tgt_ref, out_ref):
        p = pl.program_id(0)   # core split (parallel)
        j = pl.program_id(1)   # class tile (arbitrary)
        i = pl.program_id(2)   # row tile   (arbitrary, innermost -> out resident)

        @pl.when(i == 0)
        def _init():
            out_ref[...] = jnp.zeros_like(out_ref)

        def accumulate(masked):
            x = inp_ref[...].astype(jnp.float32)
            t = tgt_ref[...].astype(jnp.float32)
            prod = x * jnp.log(t + EPS)          # VPU mul + EUP log
            if masked:
                mask = None
                if has_row_tail:
                    row_rem = n - (p * tiles_per_core + i) * tm
                    rows = lax.broadcasted_iota(jnp.int32, (tm, tc), 0)
                    mask = rows < row_rem
                if has_class_tail:
                    col_rem = c - j * tc
                    cols = lax.broadcasted_iota(jnp.int32, (tm, tc), 1)
                    cm = cols < col_rem
                    mask = cm if mask is None else jnp.logical_and(mask, cm)
                # where() selects, so NaN/Inf from out-of-bounds garbage cannot
                # poison the accumulator.
                prod = jnp.where(mask, prod, 0.0)
            # VPU-only tree reduce across sublane groups: (tm, tc) -> (8, tc).
            red = jnp.sum(prod.reshape(tm // 8, 8, tc), axis=0)
            # Accumulate into the resident output block (index_map ignores i).
            out_ref[...] += red[None, :, :]

        if not need_tail:
            accumulate(False)
        else:
            conds = []
            if has_row_tail:
                conds.append((n - (p * tiles_per_core + i) * tm) < tm)
            if has_class_tail:
                conds.append((c - j * tc) < tc)
            is_tail = conds[0] if len(conds) == 1 else jnp.logical_or(conds[0], conds[1])

            @pl.when(jnp.logical_not(is_tail))
            def _full():
                accumulate(False)      # lean hot loop: 2 vld + 1 EUP + 2 VPU / vreg

            @pl.when(is_tail)
            def _tail():
                accumulate(True)       # only the ragged edge tiles pay for the mask

    return kernel


def categorical_cross_entropy(inputs: jax.Array, target: jax.Array) -> jax.Array:
    """Pallas equivalent of CategoricalCrossEntropy.forward.

    Returns a shape-(1,) float32 array: [-sum(input * log(target + eps)) / N].
    """
    assert inputs.shape == target.shape and inputs.ndim == 2
    n, c = inputs.shape
    gp = _gen_params()

    itemsize = jnp.dtype(inputs.dtype).itemsize
    # Sublane multiple for the packed dtype: f32 -> 8, bf16 -> 16, 8-bit -> 32.
    sub = {4: 8, 2: 16, 1: 32}.get(itemsize, 8)

    tile_bytes = gp["tile_bytes"]
    row_bytes = c * itemsize

    if sub * row_bytes <= tile_bytes:
        # Normal case: full class dim per tile, as many rows as the budget allows.
        tc, c_tiles = c, 1
        rows_cap = max(sub, (tile_bytes // row_bytes) // sub * sub)
        tm = int(min(rows_cap, _round_up(n, sub)))
    else:
        # Very wide class dim: tile the class axis too (128-lane multiples) so the
        # double-buffered residency stays inside the VMEM budget (critical on v7x).
        tc = int(max(128, (tile_bytes // (sub * itemsize)) // 128 * 128))
        c_tiles = int(_cdiv(c, tc))
        tm = int(sub)

    total_row_tiles = int(_cdiv(n, tm))
    n_cores = int(min(gp["n_cores"], total_row_tiles))
    tiles_per_core = int(_cdiv(total_row_tiles, n_cores))

    # Static flags: only generate the masked tail path when it can actually occur.
    has_row_tail = (total_row_tiles * tm != n) or (n_cores * tiles_per_core != total_row_tiles)
    has_class_tail = (c_tiles * tc != c)

    kernel = _make_cce_kernel(
        n=n, c=c, tm=tm, tc=tc, tiles_per_core=tiles_per_core,
        has_row_tail=has_row_tail, has_class_tail=has_class_tail)

    def in_map(p, j, i):
        g = p * tiles_per_core + i
        # Clamp: fully out-of-range duplicate tiles re-read the last valid block
        # and are zeroed by the in-kernel mask.
        return (jnp.minimum(g, total_row_tiles - 1), j)

    def out_map(p, j, i):
        return (p, 0, j)

    # 2 inputs x 2 buffers x tile + resident accumulator blocks + headroom.
    residency = 4 * tm * tc * itemsize + 4 * 8 * tc * 4
    vmem_limit = int(min(gp["vmem_cap"], max(32 * _MIB, residency + 8 * _MIB)))

    partials = pl.pallas_call(
        kernel,
        out_shape=jax.ShapeDtypeStruct((n_cores, 8, c_tiles * tc), jnp.float32),
        grid=(n_cores, c_tiles, tiles_per_core),
        in_specs=[
            pl.BlockSpec((tm, tc), in_map),
            pl.BlockSpec((tm, tc), in_map),
        ],
        out_specs=pl.BlockSpec((1, 8, tc), out_map),
        compiler_params=pltpu.CompilerParams(
            dimension_semantics=("parallel", "arbitrary", "arbitrary"),
            vmem_limit_bytes=vmem_limit,
        ),
        cost_estimate=pl.CostEstimate(
            flops=3 * n * c,
            transcendentals=n * c,
            bytes_accessed=2 * n * c * itemsize + n_cores * 8 * c_tiles * tc * 4,
        ),
    )(inputs, target)

    total = jnp.sum(partials)               # tiny XLA reduce of the partial sums
    # torch.stack([res / div]) -> shape (1,); divide by the TRUE batch size.
    return (-total / n).reshape((1,))


def _reference(inputs, target):
    return jnp.reshape(
        -jnp.sum(inputs.astype(jnp.float32)
                 * jnp.log(target.astype(jnp.float32) + EPS)) / inputs.shape[0],
        (1,))


if __name__ == "__main__":
    key = jax.random.PRNGKey(0)
    k1, k2, k3, k4 = jax.random.split(key, 4)

    # Small (batch, classes) shapes consistent with the 2-D loop in the module.
    # N=10 is deliberately not a multiple of the row tile (exercises tail masking).
    N, C = 10, 128
    inputs = jax.random.uniform(k1, (N, C), dtype=jnp.float32)
    target = jax.nn.softmax(jax.random.normal(k2, (N, C)), axis=-1)

    result = jax.block_until_ready(categorical_cross_entropy(inputs, target))
    ref = _reference(inputs, target)
    assert result.shape == (1,)
    assert jnp.allclose(result, ref, rtol=1e-5, atol=1e-5), (result, ref)

    # Second shape: odd batch and a class count that is not a multiple of 128
    # (block equals the full class dim; row tail masked in-kernel).
    N2, C2 = 37, 200
    inputs2 = jax.random.uniform(k3, (N2, C2), dtype=jnp.float32)
    target2 = jax.nn.softmax(jax.random.normal(k4, (N2, C2)), axis=-1)
    result2 = jax.block_until_ready(categorical_cross_entropy(inputs2, target2))
    ref2 = _reference(inputs2, target2)
    assert result2.shape == (1,)
    assert jnp.allclose(result2, ref2, rtol=1e-5, atol=1e-5), (result2, ref2)

    print("KERNEL_OK")
</pallas_src>

<mosaic_0001>
module attributes {stable_mosaic.version = 11 : i64} {
  func.func @kernel(%arg0: i32, %arg1: i32, %arg2: i32, %arg3: memref<16x128xf32, #tpu.memory_space<vmem>>, %arg4: memref<16x128xf32, #tpu.memory_space<vmem>>, %arg5: memref<1x8x128xf32, #tpu.memory_space<vmem>>) attributes {dimension_semantics = [#tpu.dimension_semantics<parallel>, #tpu.dimension_semantics<arbitrary>, #tpu.dimension_semantics<arbitrary>], iteration_bounds = array<i64: 1, 1, 1>, scalar_prefetch = 0 : i64, scratch_operands = 0 : i64, tpu.core_type = #tpu.core_type<tc>, window_params = [{transform_indices = @transform_0, window_bounds = array<i64: 16, 128>}, {transform_indices = @transform_1, window_bounds = array<i64: 16, 128>}, {transform_indices = @transform_2, window_bounds = array<i64: 1, 8, 128>}]} {
    %c0_i32 = arith.constant 0 : i32
    %0 = arith.cmpi eq, %arg2, %c0_i32 : i32
    %1 = arith.extui %0 : i1 to i32
    %c0_i32_0 = arith.constant 0 : i32
    %2 = arith.cmpi ne, %1, %c0_i32_0 : i32
    scf.if %2 {
      %cst = arith.constant 0.000000e+00 : f32
      %13 = vector.broadcast %cst : f32 to vector<1x8x128xf32>
      %c0 = arith.constant 0 : index
      %c0_4 = arith.constant 0 : index
      %c0_5 = arith.constant 0 : index
      %14 = vector.load %arg5[%c0, %c0_4, %c0_5] : memref<1x8x128xf32, #tpu.memory_space<vmem>>, vector<1x8x128xf32>
      tpu.vector_store %arg5[%c0, %c0_4, %c0_5], %13 {strides = array<i32>} : memref<1x8x128xf32, #tpu.memory_space<vmem>>, vector<1x8x128xf32>,
    } else {
    }
    %c1_i32 = arith.constant 1 : i32
    %3 = arith.muli %arg0, %c1_i32 : i32
    %4 = arith.addi %3, %arg2 : i32
    %c16_i32 = arith.constant 16 : i32
    %5 = arith.muli %4, %c16_i32 : i32
    %c10_i32 = arith.constant 10 : i32
    %6 = arith.subi %c10_i32, %5 : i32
    %c16_i32_1 = arith.constant 16 : i32
    %7 = arith.cmpi slt, %6, %c16_i32_1 : i32
    %true = arith.constant true
    %8 = arith.xori %7, %true : i1
    %9 = arith.extui %8 : i1 to i32
    %c0_i32_2 = arith.constant 0 : i32
    %10 = arith.cmpi ne, %9, %c0_i32_2 : i32
    scf.if %10 {
      %c0 = arith.constant 0 : index
      %c0_4 = arith.constant 0 : index
      %13 = vector.load %arg3[%c0, %c0_4] : memref<16x128xf32, #tpu.memory_space<vmem>>, vector<16x128xf32>
      %c0_5 = arith.constant 0 : index
      %c0_6 = arith.constant 0 : index
      %14 = vector.load %arg4[%c0_5, %c0_6] : memref<16x128xf32, #tpu.memory_space<vmem>>, vector<16x128xf32>
      %cst = arith.constant 9.99999997E-7 : f32
      %15 = vector.broadcast %cst : f32 to vector<16x128xf32>
      %16 = arith.addf %14, %15 : vector<16x128xf32>
      %17 = math.log %16 : vector<16x128xf32>
      %18 = arith.mulf %13, %17 : vector<16x128xf32>
      %19 = vector.shape_cast %18 : vector<16x128xf32> to vector<2x8x128xf32>
      %cst_7 = arith.constant dense<0.000000e+00> : vector<8x128xf32>
      %20 = vector.multi_reduction <add>, %19, %cst_7 [0] : vector<2x8x128xf32> to vector<8x128xf32>
      %c0_8 = arith.constant 0 : index
      %c0_9 = arith.constant 0 : index
      %c0_10 = arith.constant 0 : index
      %21 = vector.load %arg5[%c0_8, %c0_9, %c0_10] : memref<1x8x128xf32, #tpu.memory_space<vmem>>, vector<1x8x128xf32>
      %22 = vector.shape_cast %20 : vector<8x128xf32> to vector<1x8x128xf32>
      %23 = arith.addf %21, %22 : vector<1x8x128xf32>
      %c0_11 = arith.constant 0 : index
      %c0_12 = arith.constant 0 : index
      %c0_13 = arith.constant 0 : index
      %24 = vector.load %arg5[%c0_11, %c0_12, %c0_13] : memref<1x8x128xf32, #tpu.memory_space<vmem>>, vector<1x8x128xf32>
      tpu.vector_store %arg5[%c0_11, %c0_12, %c0_13], %23 {strides = array<i32>} : memref<1x8x128xf32, #tpu.memory_space<vmem>>, vector<1x8x128xf32>,
    } else {
    }
    %11 = arith.extui %7 : i1 to i32
    %c0_i32_3 = arith.constant 0 : i32
    %12 = arith.cmpi ne, %11, %c0_i32_3 : i32
    scf.if %12 {
      %c0 = arith.constant 0 : index
      %c0_4 = arith.constant 0 : index
      %13 = vector.load %arg3[%c0, %c0_4] : memref<16x128xf32, #tpu.memory_space<vmem>>, vector<16x128xf32>
      %c0_5 = arith.constant 0 : index
      %c0_6 = arith.constant 0 : index
      %14 = vector.load %arg4[%c0_5, %c0_6] : memref<16x128xf32, #tpu.memory_space<vmem>>, vector<16x128xf32>
      %cst = arith.constant 9.99999997E-7 : f32
      %15 = vector.broadcast %cst : f32 to vector<16x128xf32>
      %16 = arith.addf %14, %15 : vector<16x128xf32>
      %17 = math.log %16 : vector<16x128xf32>
      %18 = arith.mulf %13, %17 : vector<16x128xf32>
      %c1_i32_7 = arith.constant 1 : i32
      %19 = arith.muli %arg0, %c1_i32_7 : i32
      %20 = arith.addi %19, %arg2 : i32
      %c16_i32_8 = arith.constant 16 : i32
      %21 = arith.muli %20, %c16_i32_8 : i32
      %c10_i32_9 = arith.constant 10 : i32
      %22 = arith.subi %c10_i32_9, %21 : i32
      %23 = tpu.iota {dimensions = array<i32: 0>} : vector<16x128xi32>
      %24 = vector.broadcast %22 : i32 to vector<16x128xi32>
      %25 = arith.cmpi slt, %23, %24 : vector<16x128xi32>
      %cst_10 = arith.constant 0.000000e+00 : f32
      %26 = vector.broadcast %cst_10 : f32 to vector<16x128xf32>
      %27 = arith.select %25, %18, %26 : vector<16x128xi1>, vector<16x128xf32>
      %28 = vector.shape_cast %27 : vector<16x128xf32> to vector<2x8x128xf32>
      %cst_11 = arith.constant dense<0.000000e+00> : vector<8x128xf32>
      %29 = vector.multi_reduction <add>, %28, %cst_11 [0] : vector<2x8x128xf32> to vector<8x128xf32>
      %c0_12 = arith.constant 0 : index
      %c0_13 = arith.constant 0 : index
      %c0_14 = arith.constant 0 : index
      %30 = vector.load %arg5[%c0_12, %c0_13, %c0_14] : memref<1x8x128xf32, #tpu.memory_space<vmem>>, vector<1x8x128xf32>
      %31 = vector.shape_cast %29 : vector<8x128xf32> to vector<1x8x128xf32>
      %32 = arith.addf %30, %31 : vector<1x8x128xf32>
      %c0_15 = arith.constant 0 : index
      %c0_16 = arith.constant 0 : index
      %c0_17 = arith.constant 0 : index
      %33 = vector.load %arg5[%c0_15, %c0_16, %c0_17] : memref<1x8x128xf32, #tpu.memory_space<vmem>>, vector<1x8x128xf32>
      tpu.vector_store %arg5[%c0_15, %c0_16, %c0_17], %32 {strides = array<i32>} : memref<1x8x128xf32, #tpu.memory_space<vmem>>, vector<1x8x128xf32>,
    } else {
    }
    return
  }
  func.func @transform_0(%arg0: i32, %arg1: i32, %arg2: i32) -> (i32, i32) {
    %c1_i32 = arith.constant 1 : i32
    %0 = arith.muli %arg0, %c1_i32 : i32
    %1 = arith.addi %0, %arg2 : i32
    %c0_i32 = arith.constant 0 : i32
    %2 = arith.minsi %1, %c0_i32 : i32
    %c0_i32_0 = arith.constant 0 : i32
    return %2, %arg1 : i32, i32
  }
  func.func @transform_1(%arg0: i32, %arg1: i32, %arg2: i32) -> (i32, i32) {
    %c1_i32 = arith.constant 1 : i32
    %0 = arith.muli %arg0, %c1_i32 : i32
    %1 = arith.addi %0, %arg2 : i32
    %c0_i32 = arith.constant 0 : i32
    %2 = arith.minsi %1, %c0_i32 : i32
    %c0_i32_0 = arith.constant 0 : i32
    return %2, %arg1 : i32, i32
  }
  func.func @transform_2(%arg0: i32, %arg1: i32, %arg2: i32) -> (i32, i32, i32) {
    %c0_i32 = arith.constant 0 : i32
    %c0_i32_0 = arith.constant 0 : i32
    return %arg0, %c0_i32, %arg1 : i32, i32, i32
  }
}

</mosaic_0001>

<bundles_post_ra>
// kernel: tpu_custom_call.1
= control target key start
LH: loop header
LB: loop body
LE: loop exit
PB: predicated region body
PF: predicated region fallthrough
CT: control target
= control target key end

     0   :  { %7 = vsyncpa [#allocation3], 0  ;;  %s274_s0 = inlined_call_operand.hbm [shape: f32[10,128], index: 0, kind: input, shape index: {}]   ;;  %s275_s1 = inlined_call_operand.hbm [shape: f32[10,128], index: 1, kind: input, shape index: {}]   ;;  %s276_s2 = inlined_call_operand.hbm [shape: f32[1,8,128], index: 2, kind: output, shape index: {}]  }
   0x1   :  { %8 = vsyncpa [#allocation6], 0 }
   0x2   :  { %9 = vsyncpa [#allocation4], 0  ;;  %s218_s9 = smov [#allocation2]   ;;  %s146_s13 = scalar_lea.hbm %s274_s0, 256 }
   0x3   :  { %s21_s10 = sshll.u32 %s218_s9, 4  ;;  %p147_p0 = scmp.ne.s32.totalorder %s274_s0, %s146_s13  ;;  %s22_s10 = int_to_ptr.vmem [resolvable:$true] %s21_s10 }
   0x4   :  { %p150_p1 = scmp.lt.u32.totalorder %s146_s13, %s274_s0 }
   0x6   :  { %p152_p2 = pnand %p150_p1, %p147_p0 }
   0x8   :  { %155 = shalt.err (!%p152_p2)
}
   0x9   :  { %s156_s18 = scalar_lea.vmem %s22_s10, 256  ;;  %p161_p4 = scmp.lt.s32.totalorder %s22_s10, %s22_s10 }
   0xa   :  { %p157_p3 = scmp.ne.s32.totalorder %s22_s10, %s156_s18  ;;  %p162_p5 = scmp.lt.s32.totalorder %s156_s18, %s156_s18 }
   0xc   :  { %p163_p6 = por %p162_p5, %p161_p4 }
   0xe   :  { %p164_p7 = pnand %p163_p6, %p157_p3 }
  0x10   :  { %167 = shalt.err (!%p164_p7)
}
  0x11   :  { %s219_s19 = smov 128   ;;  %s220_s20 = smov 8  }
  0x12   :  { %27 = dma.hbm_to_vmem [thread:$0]  %s274_s0, 256, %s22_s10, [#allocation3], %s219_s19, %s219_s19, %s220_s20  }
  0x13   :  { %s221_s23 = smov [#allocation5]   ;;  %s168_s27 = scalar_lea.hbm %s275_s1, 256 }
  0x14   :  { %s39_s24 = sshll.u32 %s221_s23, 4  ;;  %p169_p8 = scmp.ne.s32.totalorder %s275_s1, %s168_s27  ;;  %s40_s24 = int_to_ptr.vmem [resolvable:$true] %s39_s24 }
  0x15   :  { %p172_p9 = scmp.lt.u32.totalorder %s168_s27, %s275_s1 }
  0x17   :  { %p174_p10 = pnand %p172_p9, %p169_p8 }
  0x19   :  { %177 = shalt.err (!%p174_p10)
}
  0x1a   :  { %s178_s4 = scalar_lea.vmem %s40_s24, 256  ;;  %p183_p12 = scmp.lt.s32.totalorder %s40_s24, %s40_s24 }
  0x1b   :  { %p179_p11 = scmp.ne.s32.totalorder %s40_s24, %s178_s4  ;;  %p184_p13 = scmp.lt.s32.totalorder %s178_s4, %s178_s4 }
  0x1d   :  { %p185_p0 = por %p184_p13, %p183_p12 }
  0x1f   :  { %p186_p1 = pnand %p185_p0, %p179_p11 }
  0x21   :  { %189 = shalt.err (!%p186_p1)
}
  0x22   :  { %45 = dma.hbm_to_vmem [thread:$0]  %s275_s1, 256, %s40_s24, [#allocation6], %s219_s19, %s219_s19, %s220_s20  }
  0x23   :  { %212 = dma.done.wait [#allocation3], 256  }
  0x24   :  { %213 = vsyncadd [#allocation3], 4294967040 }
  0x25   :  { %214 = dma.done.wait [#allocation6], 256  }
  0x26   :  { %215 = vsyncadd [#allocation6], 4294967040  ;;  %v94_v0 = vld [vmem:[#allocation5] sm:$0xff]  ;;  %v95_v1 = vld [vmem:[#allocation5 + $0x8] sm:$0xff]  ;;  %v104_v4 = vlaneseq  ;;  %s222_s1 = smov [#allocation7]  }
  0x27   :  { %v96_v2 = vadd.f32 1e-06, %v94_v0  ;;  %v97_v3 = vadd.f32 1e-06, %v95_v1  ;;  %v92_v8 = vld [vmem:[#allocation2] sm:$0xff]  ;;  %v93_v10 = vld [vmem:[#allocation2 + $0x8] sm:$0xff] }
  0x28   :  { %v105_v5 = vshrl.u32 %v104_v4, 7  ;;  %s122_s6 = sshll.u32 %s222_s1, 4  ;;  %s123_s6 = int_to_ptr.vmem [resolvable:$true] %s122_s6 }
  0x29   :  { %142 = vlog2.f32 %v96_v2  ;;  %s190_s7 = scalar_lea.vmem %s123_s6, 128  ;;  %p195_p3 = scmp.lt.s32.totalorder %s123_s6, %s123_s6 }
  0x2a   :  { %144 = vlog2.f32 %v97_v3  ;;  %v106_v6 = vadd.s32 8, %v105_v5  ;;  %p191_p2 = scmp.ne.s32.totalorder %s123_s6, %s190_s7  ;;  %p196_p4 = scmp.lt.s32.totalorder %s190_s7, %s190_s7 }
  0x2c   :  { %vm109_vm0 = vcmp.lt.s32.totalorder %v106_v6, 10  ;;  %p197_p5 = por %p196_p4, %p195_p3 }
  0x2e   :  { %p198_p6 = pnand %p197_p5, %p191_p2 }
  0x33   :  { %v143_v7 = vpop.eup %142 }
  0x34   :  { %v145_v9 = vpop.eup %144  ;;  %v99_v11 = vmul.f32 0.6931472, %v143_v7 }
  0x35   :  { %v101_v12 = vmul.f32 0.6931472, %v145_v9 }
  0x36   :  { %v102_v13 = vmul.f32 %v99_v11, %v92_v8 }
  0x37   :  { %v103_v14 = vmul.f32 %v101_v12, %v93_v10 }
  0x39   :  { %v111_v15 = vsel %vm109_vm0, %v103_v14, 0.0 }
  0x3a   :  { %v112_v16 = vadd.f32 %v111_v15, %v102_v13 }
  0x3c   :  { %115 = vst [vmem:[#allocation7] sm:$0xff] %v112_v16 }
  0x3d   :  { %201 = shalt.err (!%p198_p6)
}
  0x3e   :  { %s202_s10 = scalar_lea.hbm %s276_s2, 128 }
  0x3f   :  { %p203_p7 = scmp.ne.s32.totalorder %s276_s2, %s202_s10  ;;  %p206_p8 = scmp.lt.u32.totalorder %s202_s10, %s276_s2 }
  0x41   :  { %p208_p9 = pnand %p206_p8, %p203_p7 }
  0x43   :  { %211 = shalt.err (!%p208_p9)
}
  0x44   :  { %125 = dma.vmem_to_hbm [thread:$0]  %s123_s6, 128, %s276_s2, [#allocation4]  }
  0x45   :  { %216 = dma.done.wait [#allocation4], 128  }
  0x46   :  { %217 = vsyncadd [#allocation4], 4294967168 }
  0x47   :  { %129 = vsyncpa [#allocation3], 1 }
  0x48   :  { %130 = vsyncpa [#allocation6], 1 }
  0x49   :  { %131 = vsyncpa [#allocation4], 1 }

</bundles_post_ra>
